<compile_context>
chip_gen: v7x
topology: tpu7x:2x2x1
jax: 0.10.0
libtpu: 0.0.40
codegen_flags: <defaults>
</compile_context>

<pallas_src>
import functools

import jax
import jax.numpy as jnp
from jax.experimental import pallas as pl
from jax.experimental.pallas import tpu as pltpu


def _round_up(n, m):
    return ((n + m - 1) // m) * m


def _choose_tile_b(B, D, C, block_b, vmem_budget_bytes=24 * 1024 * 1024):
    """Pick a batch tile: multiple of 8, as large as the VMEM budget allows."""
    # rough per-row f32 footprint: x tile (double-buffered) + gathered centers
    # + squared diff + one-hot row
    per_row = (2 * D + D + D + C) * 4
    avail = max(vmem_budget_bytes - 2 * C * D * 4, 8 * per_row)
    t = min(block_b, max(8, avail // per_row))
    t = min(t, _round_up(B, 8))
    return max(8, (t // 8) * 8)


def center_loss_kernel(x_ref, labels_ref, centers_ref, out_ref, acc_ref, *,
                       batch_size, tile_b, num_classes):
    i = pl.program_id(0)
    nb = pl.num_programs(0)

    @pl.when(i == 0)
    def _init():
        acc_ref[...] = jnp.zeros_like(acc_ref)

    # ---- gather each sample's center row with a one-hot MXU matmul ----------
    cen = centers_ref[...]                                        # (C, D)
    labels = labels_ref[...]                                      # (TB, 1) int32
    class_ids = jax.lax.broadcasted_iota(jnp.int32, (tile_b, num_classes), 1)
    onehot = (labels == class_ids).astype(cen.dtype)              # (TB, C)
    c_gath = jnp.dot(onehot, cen,
                     preferred_element_type=jnp.float32)          # (TB, D) f32

    # ---- per-sample squared distance to its own center ----------------------
    d = x_ref[...].astype(jnp.float32) - c_gath                   # (TB, D)
    dist = jnp.sum(d * d, axis=1, keepdims=True)                  # (TB, 1)
    dist = jnp.clip(dist, 1e-12, 1e12)

    if batch_size % tile_b != 0:
        # Last (partial) tile: zero the contributions of tail rows whose x data
        # is the undefined block padding.
        row = i * tile_b + jax.lax.broadcasted_iota(jnp.int32, (tile_b, 1), 0)
        dist = jnp.where(row < batch_size, dist, 0.0)

    acc_ref[...] += dist

    @pl.when(i == nb - 1)
    def _finalize():
        total = jnp.sum(acc_ref[...], keepdims=True)              # (1, 1)
        # PyTorch clamps AFTER masking, so every masked-out (i, j) entry
        # contributes exactly 1e-12 -> constant +(C-1)*1e-12 on the mean.
        out_ref[...] = (total / jnp.float32(batch_size)
                        + jnp.float32((num_classes - 1) * 1e-12))


def center_loss(x, centers, labels, *, block_b=1024):
    """x: (B, D) float, centers: (C, D) float, labels: (B,) int -> scalar f32."""
    B, D = x.shape
    C, Dc = centers.shape
    assert D == Dc

    tile_b = _choose_tile_b(B, D, C, block_b)
    num_tiles = (B + tile_b - 1) // tile_b
    b_pad = num_tiles * tile_b

    labels = labels.astype(jnp.int32)
    if b_pad != B:
        # Only labels are padded (cheap).  x is NOT padded: the grid uses
        # cdiv(B, tile_b) and the kernel masks the tail rows.
        labels = jnp.pad(labels, (0, b_pad - B))
    labels2d = labels.reshape(b_pad, 1)

    kernel = functools.partial(center_loss_kernel,
                               batch_size=B, tile_b=tile_b, num_classes=C)

    out = pl.pallas_call(
        kernel,
        out_shape=jax.ShapeDtypeStruct((1, 1), jnp.float32),
        grid_spec=pltpu.PrefetchScalarGridSpec(
            num_scalar_prefetch=0,
            grid=(num_tiles,),
            in_specs=[
                pl.BlockSpec((tile_b, D), lambda i: (i, 0)),   # x batch tile
                pl.BlockSpec((tile_b, 1), lambda i: (i, 0)),   # labels tile
                pl.BlockSpec((C, D), lambda i: (0, 0)),        # centers, resident
            ],
            out_specs=pl.BlockSpec((1, 1), lambda i: (0, 0)),
            scratch_shapes=[
                pltpu.VMEM((tile_b, 1), jnp.float32),          # per-row partial sums
            ],
        ),
        compiler_params=pltpu.CompilerParams(
            dimension_semantics=("arbitrary",),   # accumulator carried across tiles
            vmem_limit_bytes=48 * 1024 * 1024,
        ),
    )(x, labels2d, centers)
    return out[0, 0]


def _ref_loss(x, centers, labels):
    """Pure-JAX reference, same math as the PyTorch forward (clamp after mask)."""
    B = x.shape[0]
    C = centers.shape[0]
    x2 = jnp.sum(x ** 2, axis=1, keepdims=True)
    c2 = jnp.sum(centers ** 2, axis=1, keepdims=True)
    distmat = x2 + c2.T - 2.0 * (x @ centers.T)
    mask = (labels[:, None] == jnp.arange(C)[None, :]).astype(jnp.float32)
    return jnp.sum(jnp.clip(distmat * mask, 1e-12, 1e12)) / B


if __name__ == "__main__":
    # Module defaults: num_classes=7, feat_dim=7.  Small batch of 8.
    num_classes = 7
    feat_dim = 7
    batch_size = 8

    key = jax.random.PRNGKey(0)
    k_x, k_c, k_l = jax.random.split(key, 3)

    x = jax.random.normal(k_x, (batch_size, feat_dim), dtype=jnp.float32)
    # Deterministic stand-in for nn.Parameter(torch.randn(num_classes, feat_dim))
    centers = jax.random.normal(k_c, (num_classes, feat_dim), dtype=jnp.float32)
    labels = jax.random.randint(k_l, (batch_size,), 0, num_classes, dtype=jnp.int32)

    loss = center_loss(x, centers, labels)
    jax.block_until_ready(loss)
    ref = _ref_loss(x, centers, labels)
    assert jnp.allclose(loss, ref, rtol=1e-5, atol=1e-5), (loss, ref)

    # Second check: batch NOT divisible by the tile -> exercises the pad-free
    # tail path (partial x block + in-kernel row mask).
    b2 = 13
    x_b = jax.random.normal(k_x, (b2, feat_dim), dtype=jnp.float32)
    labels_b = jax.random.randint(k_l, (b2,), 0, num_classes, dtype=jnp.int32)
    loss_b = center_loss(x_b, centers, labels_b)
    jax.block_until_ready(loss_b)
    ref_b = _ref_loss(x_b, centers, labels_b)
    assert jnp.allclose(loss_b, ref_b, rtol=1e-5, atol=1e-5), (loss_b, ref_b)

    print("KERNEL_OK")
</pallas_src>

<mosaic_0001>
module attributes {stable_mosaic.version = 11 : i64} {
  func.func @center_loss_kernel(%arg0: i32, %arg1: memref<8x7xf32, #tpu.memory_space<vmem>>, %arg2: memref<8x1xi32, #tpu.memory_space<vmem>>, %arg3: memref<7x7xf32, #tpu.memory_space<vmem>>, %arg4: memref<1x1xf32, #tpu.memory_space<vmem>>, %arg5: memref<8x1xf32, #tpu.memory_space<vmem>>) attributes {dimension_semantics = [#tpu.dimension_semantics<arbitrary>], iteration_bounds = array<i64: 1>, scalar_prefetch = 0 : i64, scratch_operands = 1 : i64, tpu.core_type = #tpu.core_type<tc>, window_params = [{transform_indices = @transform_0, window_bounds = array<i64: 8, 7>}, {transform_indices = @transform_1, window_bounds = array<i64: 8, 1>}, {pipeline_mode = #tpu.pipeline_mode<synchronous>, transform_indices = @transform_2, window_bounds = array<i64: 7, 7>}, {pipeline_mode = #tpu.pipeline_mode<synchronous>, transform_indices = @transform_3, window_bounds = array<i64: 1, 1>}]} {
    %c0_i32 = arith.constant 0 : i32
    %0 = arith.cmpi eq, %arg0, %c0_i32 : i32
    %1 = arith.extui %0 : i1 to i32
    %c0_i32_0 = arith.constant 0 : i32
    %2 = arith.cmpi ne, %1, %c0_i32_0 : i32
    scf.if %2 {
      %cst_15 = arith.constant 0.000000e+00 : f32
      %26 = vector.broadcast %cst_15 : f32 to vector<8x1xf32>
      %c0_16 = arith.constant 0 : index
      %c0_17 = arith.constant 0 : index
      %27 = vector.load %arg5[%c0_16, %c0_17] : memref<8x1xf32, #tpu.memory_space<vmem>>, vector<8x1xf32>
      tpu.vector_store %arg5[%c0_16, %c0_17], %26 {strides = array<i32>} : memref<8x1xf32, #tpu.memory_space<vmem>>, vector<8x1xf32>,
    } else {
    }
    %c0 = arith.constant 0 : index
    %c0_1 = arith.constant 0 : index
    %3 = vector.load %arg3[%c0, %c0_1] : memref<7x7xf32, #tpu.memory_space<vmem>>, vector<7x7xf32>
    %c0_2 = arith.constant 0 : index
    %c0_3 = arith.constant 0 : index
    %4 = vector.load %arg2[%c0_2, %c0_3] : memref<8x1xi32, #tpu.memory_space<vmem>>, vector<8x1xi32>
    %5 = tpu.iota {dimensions = array<i32: 1>} : vector<8x7xi32>
    %6 = vector.broadcast %4 : vector<8x1xi32> to vector<8x7xi32>
    %7 = arith.cmpi eq, %6, %5 : vector<8x7xi32>
    %8 = arith.extui %7 : vector<8x7xi1> to vector<8x7xi32>
    %9 = arith.sitofp %8 : vector<8x7xi32> to vector<8x7xf32>
    %cst = arith.constant dense<0.000000e+00> : vector<8x7xf32>
    %10 = tpu.matmul %9, %3, %cst {dimension_numbers = #tpu.dot_dimension_numbers<[1], [0], [0], [1], [0, 0, 1, 1], [], []>} : vector<8x7xf32>, vector<7x7xf32>, vector<8x7xf32> -> vector<8x7xf32>
    %c0_4 = arith.constant 0 : index
    %c0_5 = arith.constant 0 : index
    %11 = vector.load %arg1[%c0_4, %c0_5] : memref<8x7xf32, #tpu.memory_space<vmem>>, vector<8x7xf32>
    %12 = arith.subf %11, %10 : vector<8x7xf32>
    %13 = arith.mulf %12, %12 : vector<8x7xf32>
    %cst_6 = arith.constant dense<0.000000e+00> : vector<8xf32>
    %14 = vector.multi_reduction <add>, %13, %cst_6 [1] : vector<8x7xf32> to vector<8xf32>
    %15 = vector.shape_cast %14 : vector<8xf32> to vector<8x1xf32>
    %cst_7 = arith.constant 9.99999996E-13 : f32
    %cst_8 = arith.constant 9.99999995E+11 : f32
    %16 = vector.broadcast %cst_7 : f32 to vector<8x1xf32>
    %17 = arith.maximumf %16, %15 : vector<8x1xf32>
    %18 = vector.broadcast %cst_8 : f32 to vector<8x1xf32>
    %19 = arith.minimumf %18, %17 : vector<8x1xf32>
    %c0_9 = arith.constant 0 : index
    %c0_10 = arith.constant 0 : index
    %20 = vector.load %arg5[%c0_9, %c0_10] : memref<8x1xf32, #tpu.memory_space<vmem>>, vector<8x1xf32>
    %21 = arith.addf %20, %19 : vector<8x1xf32>
    %c0_11 = arith.constant 0 : index
    %c0_12 = arith.constant 0 : index
    %22 = vector.load %arg5[%c0_11, %c0_12] : memref<8x1xf32, #tpu.memory_space<vmem>>, vector<8x1xf32>
    tpu.vector_store %arg5[%c0_11, %c0_12], %21 {strides = array<i32>} : memref<8x1xf32, #tpu.memory_space<vmem>>, vector<8x1xf32>,
    %c0_i32_13 = arith.constant 0 : i32
    %23 = arith.cmpi eq, %arg0, %c0_i32_13 : i32
    %24 = arith.extui %23 : i1 to i32
    %c0_i32_14 = arith.constant 0 : i32
    %25 = arith.cmpi ne, %24, %c0_i32_14 : i32
    scf.if %25 {
      %c0_15 = arith.constant 0 : index
      %c0_16 = arith.constant 0 : index
      %26 = vector.load %arg5[%c0_15, %c0_16] : memref<8x1xf32, #tpu.memory_space<vmem>>, vector<8x1xf32>
      %27 = vector.shape_cast %26 : vector<8x1xf32> to vector<1x8x1xf32>
      %cst_17 = arith.constant dense<0.000000e+00> : vector<1xf32>
      %28 = vector.multi_reduction <add>, %27, %cst_17 [1, 2] : vector<1x8x1xf32> to vector<1xf32>
      %29 = vector.shape_cast %28 : vector<1xf32> to vector<1x1x1xf32>
      %30 = vector.extract %29[0, 0, 0] : f32 from vector<1x1x1xf32>
      %31 = vector.broadcast %30 : f32 to vector<1x1xf32>
      %cst_18 = arith.constant 8.000000e+00 : f32
      %32 = vector.broadcast %cst_18 : f32 to vector<1x1xf32>
      %33 = arith.divf %31, %32 : vector<1x1xf32>
      %cst_19 = arith.constant 5.99999997E-12 : f32
      %34 = vector.broadcast %cst_19 : f32 to vector<1x1xf32>
      %35 = arith.addf %33, %34 : vector<1x1xf32>
      %c0_20 = arith.constant 0 : index
      %c0_21 = arith.constant 0 : index
      %36 = vector.load %arg4[%c0_20, %c0_21] : memref<1x1xf32, #tpu.memory_space<vmem>>, vector<1x1xf32>
      tpu.vector_store %arg4[%c0_20, %c0_21], %35 {strides = array<i32>} : memref<1x1xf32, #tpu.memory_space<vmem>>, vector<1x1xf32>,
    } else {
    }
    return
  }
  func.func @transform_0(%arg0: i32) -> (i32, i32) {
    %c0_i32 = arith.constant 0 : i32
    %c0_i32_0 = arith.constant 0 : i32
    return %arg0, %c0_i32 : i32, i32
  }
  func.func @transform_1(%arg0: i32) -> (i32, i32) {
    %c0_i32 = arith.constant 0 : i32
    %c0_i32_0 = arith.constant 0 : i32
    return %arg0, %c0_i32 : i32, i32
  }
  func.func @transform_2(%arg0: i32) -> (i32, i32) {
    %c0_i32 = arith.constant 0 : i32
    %c0_i32_0 = arith.constant 0 : i32
    %c0_i32_1 = arith.constant 0 : i32
    return %c0_i32, %c0_i32_0 : i32, i32
  }
  func.func @transform_3(%arg0: i32) -> (i32, i32) {
    %c0_i32 = arith.constant 0 : i32
    %c0_i32_0 = arith.constant 0 : i32
    %c0_i32_1 = arith.constant 0 : i32
    return %c0_i32, %c0_i32_0 : i32, i32
  }
}

</mosaic_0001>

<bundles_post_ra>
// kernel: tpu_custom_call.1
= control target key start
LH: loop header
LB: loop body
LE: loop exit
PB: predicated region body
PF: predicated region fallthrough
CT: control target
= control target key end

     0   :  { %s241_s0 = inlined_call_operand.vmem [shape: f32[8,7], index: 0, kind: input, shape index: {}]   ;;  %s242_s1 = inlined_call_operand.vmem [shape: s32[8,1], index: 1, kind: input, shape index: {}]   ;;  %s243_s2 = inlined_call_operand.vmem [shape: f32[7,7], index: 2, kind: input, shape index: {}]   ;;  %s244_s3 = inlined_call_operand.hbm [shape: f32[1,1], index: 3, kind: output, shape index: {}]  }
   0x1   :  { %v22_v0 = vld [vmem:[%s242_s1] sm:$0xff] }
   0x2   :  { %8 = vsyncpa [#allocation4], 0  ;;  %v196_v1 = vmov 0   ;;  %v197_v2 = vmov 0.0   ;;  %v21_v3 = vld [vmem:[%s243_s2] sm:$0x7f]  ;;  %v23_v4 = vlaneseq }
   0x3   :  { %171 = vset.pattern.permute.xlu0 %v196_v1  ;;  %160 = vmatprep.subr.mxu0 %v197_v2  ;;  %vm35_vm0 = vcmask 1046528   ;;  %vm198_vm1 = vmmov 0   ;;  %vm31_vm2 = vcmask 56320   ;;  %v109_v8 = vld [vmem:[%s241_s0] sm:$0xff]  ;;  %vm19_vm4 = vcmask 7168   ;;  %s199_s2 = smov [#allocation3]  }
   0x4   :  { %26 = vperm.xlu0 %171, %v22_v0   ;;  %161 = vmatpush3.msk.msra.mxu0 %vm35_vm0, %v21_v3  ;;  %v24_v5 = vand.u32 127, %v23_v4  ;;  %20 = vst.msk [vmem:[#allocation2] sm:$0xff] %vm19_vm4, %v197_v2  ;;  %s147_s17 = sshll.u32 %s199_s2, 4  ;;  %vm139_vm5 = vcmask 0   ;;  %s148_s17 = int_to_ptr.vmem [resolvable:$true] %s147_s17 }
   0x5   :  { %162 = vmatprep.mubr.msk.f32.mxu0 %vm198_vm1, %v197_v2  ;;  %s172_s18 = scalar_lea.vmem %s148_s17, 16  ;;  %s176_s19 = scalar_lea.vmem %s148_s17, 32 }
   0x6   :  { %p173_p0 = scmp.ne.s32.totalorder %s148_s17, %s172_s18  ;;  %p177_p1 = scmp.lt.s32.totalorder %s148_s17, %s148_s17 }
   0x7   :  { %p178_p2 = scmp.lt.s32.totalorder %s176_s19, %s172_s18 }
   0x9   :  { %p179_p3 = por %p178_p2, %p177_p1 }
   0xb   :  { %v117_v16 = vld [vmem:[#allocation2] sm:$0xff]  ;;  %p180_p4 = pnand %p179_p3, %p173_p0 }
  0x83   :  { %v27_v6 = vpop.permute.xlu0 %26 }
  0x84   :  { %vm28_vm3 = vcmp.eq.s32.totalorder %v27_v6, %v24_v5 }
  0x85   :  { %v155_v7 = vsel %vm28_vm3, 1.0, %v197_v2 }
  0x86   :  { %163 = vmatmul.mubr.msk.f32.vlgmr.msra.gmra.mrb[0].mxu0 %vm31_vm2, %v155_v7 }
 0x159   :  { %v105_v9 = vpop.f32.mrb[0].mxu0 }
 0x15a   :  { %v110_v10 = vsub.f32 %v109_v8, %v105_v9  ;;  %v164_v11 = vpop.f32.mrb[1].mxu0 }
 0x15c   :  { %v111_v12 = vmul.f32 %v110_v10, %v110_v10 }
 0x15e   :  { %v112_v13 = vsel %vm31_vm2, %v111_v12, 0.0 }
 0x15f   :  { %113 = vadd.xlane.f32.xlu0 %v112_v13 }
 0x1ec   :  { %v114_v14 = vpop.xlane.xlu0 %113 }
 0x1ed   :  { %v115_v15 = vmax.f32 %v114_v14, 1e-12 }
 0x1ef   :  { %v116_v17 = vmin.f32 %v115_v15, 1e+12 }
 0x1f1   :  { %v118_v18 = vadd.f32 %v117_v16, %v116_v17 }
 0x1f3   :  { %120 = vst.msk [vmem:[#allocation2] sm:$0xff] %vm19_vm4, %v118_v18 }
 0x1fa   :  { %v124_v19 = vld [vmem:[#allocation2] sm:$0xff] }
 0x1fb   :  { %v125_v20 = vsel %vm19_vm4, %v124_v19, 0.0 }
 0x1fc   :  { %126 = vadd.xlane.f32.xlu1 %v125_v20 }
 0x289   :  { %v127_v21 = vpop.xlane.xlu1 %126 }
 0x28a   :  { %v128_v22 = vrot.slane %v127_v21, 4 }
 0x28c   :  { %v129_v23 = vadd.f32 %v128_v22, %v127_v21 }
 0x28e   :  { %v130_v24 = vrot.slane %v129_v23, 2 }
 0x290   :  { %v131_v25 = vadd.f32 %v130_v24, %v129_v23 }
 0x292   :  { %v132_v26 = vrot.slane %v131_v25, 1 }
 0x294   :  { %v133_v27 = vadd.f32 %v132_v26, %v131_v25 }
 0x296   :  { %165 = vpush %v133_v27 }
 0x2c7   :  { %s166_s0 = spop %165 }
 0x2c8   :  { %v135_v28 = vstv %s166_s0 }
 0x2c9   :  { %v137_v29 = vmul.f32 0.125, %v135_v28 }
 0x2cb   :  { %v138_v30 = vadd.f32 6e-12, %v137_v29 }
 0x2cd   :  { %140 = vst.msk [vmem:[#allocation3] sm:$0x1] %vm139_vm5, %v138_v30 }
 0x2ce   :  { %183 = shalt.err (!%p180_p4)
}
 0x2cf   :  { %s184_s22 = scalar_lea.hbm %s244_s3, 16 }
 0x2d0   :  { %p185_p5 = scmp.ne.s32.totalorder %s244_s3, %s184_s22  ;;  %p188_p6 = scmp.lt.u32.totalorder %s184_s22, %s244_s3 }
 0x2d2   :  { %p190_p7 = pnand %p188_p6, %p185_p5 }
 0x2d4   :  { %193 = shalt.err (!%p190_p7)
}
 0x2d5   :  { %150 = dma.vmem_to_hbm [thread:$0]  %s148_s17, 16, %s244_s3, [#allocation4]  }
 0x2d6   :  { %194 = dma.done.wait [#allocation4], 16  }
 0x2d7   :  { %195 = vsyncadd [#allocation4], 4294967280 }
 0x2d8   :  { %154 = vsyncpa [#allocation4], 1 }

</bundles_post_ra>
